<compile_context>
chip_gen: v7x
topology: tpu7x:2x2x1
jax: 0.10.0
libtpu: 0.0.40
codegen_flags: <defaults>
</compile_context>

<pallas_src>
import jax
import jax.numpy as jnp
from jax import lax
from jax.experimental import pallas as pl
from jax.experimental.pallas import tpu as pltpu


def _round_up(x, m):
    return (x + m - 1) // m * m


def _decoder_kernel(r_ref, w1_ref, b1_ref, w2t_ref, b2t_ref, out_ref):
    r = r_ref[...]                                               # (tb, N)

    # Fused hidden layer: [H | H2] = relu(r @ [Wh | Wh2] + [bh | bh2])
    hh = jnp.dot(r, w1_ref[...], preferred_element_type=jnp.float32)
    hh = jnp.maximum(hh + b1_ref[...], 0.0)                      # (tb, 2M)

    # Fused heads with a block-diagonal weight, contracted over 2M on both
    # operands -> result directly (2, tb):
    #   row 0 = wm . H + bm,  row 1 = ws . H2 + bs.
    # The store is lane-dense (tb lanes wide) instead of two masked width-1
    # stores; no explicit transpose of hh is materialized.
    out = lax.dot_general(
        w2t_ref[...], hh,
        dimension_numbers=(((1,), (1,)), ((), ())),
        preferred_element_type=jnp.float32,
    )                                                            # (2, tb)
    out_ref[...] = out + b2t_ref[...]


def mlp_decoder_2n(r, params, *, tb=512):
    """Fused MLPDecoder2n forward.  r: (B, N) float32.  Returns (mu, log_sigma)."""
    B, N = r.shape
    wh, bh, wh2, bh2, wm, bm, ws, bs = params
    M = wh.shape[1]
    M2 = 2 * M

    # ---- fuse parameters (tiny arrays; done once outside the kernel) -------
    w1 = jnp.concatenate([wh, wh2], axis=1)                      # (N, 2M)
    b1 = jnp.concatenate([bh, bh2], axis=1)                      # (1, 2M)
    zeros = jnp.zeros((M,), wm.dtype)
    w2t = jnp.stack([jnp.concatenate([wm[:, 0], zeros]),         # (2, 2M) block-diag
                     jnp.concatenate([zeros, ws[:, 0]])], axis=0)
    b2t = jnp.concatenate([bm, bs], axis=0)                      # (2, 1)

    # ---- choose the batch tile ---------------------------------------------
    Bp = _round_up(B, 8)
    if Bp <= tb:
        tb_eff = Bp                        # whole batch in one tile
        if Bp % 256 == 0:                  # big enough: split so 2 TCs both work
            tb_eff = Bp // 2
    else:
        tb_eff = _round_up(tb, 128)        # keep lane-dense output blocks when grid > 1
        Bp = _round_up(B, tb_eff)
    if Bp != B:
        r = jnp.pad(r, ((0, Bp - B), (0, 0)))

    grid = (Bp // tb_eff,)

    out = pl.pallas_call(
        _decoder_kernel,
        out_shape=jax.ShapeDtypeStruct((2, Bp), jnp.float32),
        grid_spec=pltpu.PrefetchScalarGridSpec(
            num_scalar_prefetch=0,
            grid=grid,
            in_specs=[
                pl.BlockSpec((tb_eff, N), lambda i: (i, 0)),     # r tile (streams over grid)
                pl.BlockSpec((N, M2), lambda i: (0, 0)),         # fused hidden weight
                pl.BlockSpec((1, M2), lambda i: (0, 0)),         # fused hidden bias
                pl.BlockSpec((2, M2), lambda i: (0, 0)),         # fused head weight (transposed)
                pl.BlockSpec((2, 1), lambda i: (0, 0)),          # fused head bias (column)
            ],
            out_specs=pl.BlockSpec((2, tb_eff), lambda i: (0, i)),
        ),
        compiler_params=pltpu.CompilerParams(
            dimension_semantics=("parallel",)),
    )(r, w1, b1, w2t, b2t)

    # torch.squeeze semantics: (B,) for B > 1, scalar for B == 1.
    mu = jnp.squeeze(out[0, :B])
    log_sigma = jnp.squeeze(out[1, :B])
    return mu, log_sigma


def init_params(key, N, M):
    """Synthetic parameters matching the nn.Linear shapes (stored pre-transposed).

    hidden / hidden2: Linear(N, M) -> kernel uses (N, M) weight, (1, M) bias
    wm / ws:          Linear(M, 1) -> kernel uses (M, 1) weight, (1, 1) bias
    """
    ks = jax.random.split(key, 8)
    scale_h = 1.0 / jnp.sqrt(N)
    scale_o = 1.0 / jnp.sqrt(M)
    wh = jax.random.uniform(ks[0], (N, M), jnp.float32, -scale_h, scale_h)
    bh = jax.random.uniform(ks[1], (1, M), jnp.float32, -scale_h, scale_h)
    wh2 = jax.random.uniform(ks[2], (N, M), jnp.float32, -scale_h, scale_h)
    bh2 = jax.random.uniform(ks[3], (1, M), jnp.float32, -scale_h, scale_h)
    wm = jax.random.uniform(ks[4], (M, 1), jnp.float32, -scale_o, scale_o)
    bm = jax.random.uniform(ks[5], (1, 1), jnp.float32, -scale_o, scale_o)
    ws = jax.random.uniform(ks[6], (M, 1), jnp.float32, -scale_o, scale_o)
    bs = jax.random.uniform(ks[7], (1, 1), jnp.float32, -scale_o, scale_o)
    return (wh, bh, wh2, bh2, wm, bm, ws, bs)


def reference_forward(r, params):
    wh, bh, wh2, bh2, wm, bm, ws, bs = params
    H = jnp.maximum(r @ wh + bh, 0.0)
    H2 = jnp.maximum(r @ wh2 + bh2, 0.0)
    mu = H @ wm + bm
    log_sigma = H2 @ ws + bs
    return jnp.squeeze(mu), jnp.squeeze(log_sigma)


if __name__ == "__main__":
    key = jax.random.PRNGKey(0)
    k_r, k_p = jax.random.split(key)

    B, N, M = 16, 32, 64
    r = jax.random.normal(k_r, (B, N), jnp.float32)
    params = init_params(k_p, N, M)

    fwd = jax.jit(mlp_decoder_2n)
    mu, log_sigma = fwd(r, params)
    jax.block_until_ready((mu, log_sigma))

    mu_ref, ls_ref = reference_forward(r, params)
    assert mu.shape == (B,) and log_sigma.shape == (B,)
    assert jnp.allclose(mu, mu_ref, atol=1e-5, rtol=1e-5)
    assert jnp.allclose(log_sigma, ls_ref, atol=1e-5, rtol=1e-5)

    # Also exercise a larger, multi-tile batch path once.
    B2 = 1024
    r2 = jax.random.normal(k_r, (B2, N), jnp.float32)
    mu2, ls2 = jax.jit(mlp_decoder_2n)(r2, params)
    jax.block_until_ready((mu2, ls2))
    mu2_ref, ls2_ref = reference_forward(r2, params)
    assert jnp.allclose(mu2, mu2_ref, atol=1e-5, rtol=1e-5)
    assert jnp.allclose(ls2, ls2_ref, atol=1e-5, rtol=1e-5)

    print("KERNEL_OK")
</pallas_src>

<mosaic_0001>
module attributes {stable_mosaic.version = 11 : i64} {
  func.func @_decoder_kernel(%arg0: i32, %arg1: memref<16x32xf32, #tpu.memory_space<vmem>>, %arg2: memref<32x128xf32, #tpu.memory_space<vmem>>, %arg3: memref<1x128xf32, #tpu.memory_space<vmem>>, %arg4: memref<2x128xf32, #tpu.memory_space<vmem>>, %arg5: memref<2x1xf32, #tpu.memory_space<vmem>>, %arg6: memref<2x16xf32, #tpu.memory_space<vmem>>) attributes {dimension_semantics = [#tpu.dimension_semantics<parallel>], iteration_bounds = array<i64: 1>, scalar_prefetch = 0 : i64, scratch_operands = 0 : i64, tpu.core_type = #tpu.core_type<tc>, window_params = [{transform_indices = @transform_0, window_bounds = array<i64: 16, 32>}, {pipeline_mode = #tpu.pipeline_mode<synchronous>, transform_indices = @transform_1, window_bounds = array<i64: 32, 128>}, {pipeline_mode = #tpu.pipeline_mode<synchronous>, transform_indices = @transform_2, window_bounds = array<i64: 1, 128>}, {pipeline_mode = #tpu.pipeline_mode<synchronous>, transform_indices = @transform_3, window_bounds = array<i64: 2, 128>}, {pipeline_mode = #tpu.pipeline_mode<synchronous>, transform_indices = @transform_4, window_bounds = array<i64: 2, 1>}, {transform_indices = @transform_5, window_bounds = array<i64: 2, 16>}]} {
    %c0 = arith.constant 0 : index
    %c0_0 = arith.constant 0 : index
    %0 = vector.load %arg1[%c0, %c0_0] : memref<16x32xf32, #tpu.memory_space<vmem>>, vector<16x32xf32>
    %c0_1 = arith.constant 0 : index
    %c0_2 = arith.constant 0 : index
    %1 = vector.load %arg2[%c0_1, %c0_2] : memref<32x128xf32, #tpu.memory_space<vmem>>, vector<32x128xf32>
    %cst = arith.constant dense<0.000000e+00> : vector<16x128xf32>
    %2 = tpu.matmul %0, %1, %cst {dimension_numbers = #tpu.dot_dimension_numbers<[1], [0], [0], [1], [0, 0, 1, 1], [], []>} : vector<16x32xf32>, vector<32x128xf32>, vector<16x128xf32> -> vector<16x128xf32>
    %c0_3 = arith.constant 0 : index
    %c0_4 = arith.constant 0 : index
    %3 = vector.load %arg3[%c0_3, %c0_4] : memref<1x128xf32, #tpu.memory_space<vmem>>, vector<1x128xf32>
    %4 = vector.broadcast %3 : vector<1x128xf32> to vector<16x128xf32>
    %5 = arith.addf %2, %4 : vector<16x128xf32>
    %cst_5 = arith.constant 0.000000e+00 : f32
    %6 = vector.broadcast %cst_5 : f32 to vector<16x128xf32>
    %7 = arith.maximumf %5, %6 : vector<16x128xf32>
    %c0_6 = arith.constant 0 : index
    %c0_7 = arith.constant 0 : index
    %8 = vector.load %arg4[%c0_6, %c0_7] : memref<2x128xf32, #tpu.memory_space<vmem>>, vector<2x128xf32>
    %cst_8 = arith.constant dense<0.000000e+00> : vector<2x16xf32>
    %9 = tpu.matmul %8, %7, %cst_8 {dimension_numbers = #tpu.dot_dimension_numbers<[1], [1], [0], [0], [0, 0, 1, 0], [], []>} : vector<2x128xf32>, vector<16x128xf32>, vector<2x16xf32> -> vector<2x16xf32>
    %c0_9 = arith.constant 0 : index
    %c0_10 = arith.constant 0 : index
    %10 = vector.load %arg5[%c0_9, %c0_10] : memref<2x1xf32, #tpu.memory_space<vmem>>, vector<2x1xf32>
    %11 = vector.broadcast %10 : vector<2x1xf32> to vector<2x16xf32>
    %12 = arith.addf %9, %11 : vector<2x16xf32>
    %c0_11 = arith.constant 0 : index
    %c0_12 = arith.constant 0 : index
    %13 = vector.load %arg6[%c0_11, %c0_12] : memref<2x16xf32, #tpu.memory_space<vmem>>, vector<2x16xf32>
    tpu.vector_store %arg6[%c0_11, %c0_12], %12 {strides = array<i32>} : memref<2x16xf32, #tpu.memory_space<vmem>>, vector<2x16xf32>,
    return
  }
  func.func @transform_0(%arg0: i32) -> (i32, i32) {
    %c0_i32 = arith.constant 0 : i32
    %c0_i32_0 = arith.constant 0 : i32
    return %arg0, %c0_i32 : i32, i32
  }
  func.func @transform_1(%arg0: i32) -> (i32, i32) {
    %c0_i32 = arith.constant 0 : i32
    %c0_i32_0 = arith.constant 0 : i32
    %c0_i32_1 = arith.constant 0 : i32
    return %c0_i32, %c0_i32_0 : i32, i32
  }
  func.func @transform_2(%arg0: i32) -> (i32, i32) {
    %c0_i32 = arith.constant 0 : i32
    %c0_i32_0 = arith.constant 0 : i32
    %c0_i32_1 = arith.constant 0 : i32
    return %c0_i32, %c0_i32_0 : i32, i32
  }
  func.func @transform_3(%arg0: i32) -> (i32, i32) {
    %c0_i32 = arith.constant 0 : i32
    %c0_i32_0 = arith.constant 0 : i32
    %c0_i32_1 = arith.constant 0 : i32
    return %c0_i32, %c0_i32_0 : i32, i32
  }
  func.func @transform_4(%arg0: i32) -> (i32, i32) {
    %c0_i32 = arith.constant 0 : i32
    %c0_i32_0 = arith.constant 0 : i32
    %c0_i32_1 = arith.constant 0 : i32
    return %c0_i32, %c0_i32_0 : i32, i32
  }
  func.func @transform_5(%arg0: i32) -> (i32, i32) {
    %c0_i32 = arith.constant 0 : i32
    %c0_i32_0 = arith.constant 0 : i32
    return %c0_i32, %arg0 : i32, i32
  }
}

</mosaic_0001>

<bundles_post_ra>
// kernel: mlp_decoder_2n.1
= control target key start
LH: loop header
LB: loop body
LE: loop exit
PB: predicated region body
PF: predicated region fallthrough
CT: control target
= control target key end

     0   :  { %vm33_vm0 = vcmask 261120   ;;  %v246_v8 = vmov 0.0|0.0   ;;  %vm247_vm1 = vmmov 0   ;;  %v248_v9 = vmov 0.0   ;;  %s310_s1 = inlined_call_operand.vmem [shape: f32[32,128], index: 1, kind: input, shape index: {}]   ;;  %s311_s0 = inlined_call_operand.vmem [shape: f32[16,32], index: 0, kind: input, shape index: {}]   ;;  %s312_s4 = inlined_call_operand.vmem [shape: f32[2,1], index: 4, kind: input, shape index: {}]   ;;  %s313_s2 = inlined_call_operand.vmem [shape: f32[1,128], index: 2, kind: input, shape index: {}]   ;;  %s314_s3 = inlined_call_operand.vmem [shape: f32[2,128], index: 3, kind: input, shape index: {}]   ;;  %s315_s5 = inlined_call_operand.vmem [shape: f32[2,16], index: 5, kind: output, shape index: {}]  }
   0x1   :  { %v22_v0 = vld [vmem:[%s310_s1] sm:$0xff]  ;;  %v23_v1 = vld [vmem:[%s310_s1 + $0x8] sm:$0xff]  ;;  %v24_v2 = vld [vmem:[%s310_s1 + $0x10] sm:$0xff]  ;;  %238 = vmatprep.subr.bf16.mxu1 %v246_v8  ;;  %227 = vmatprep.mubr.msk.f32.mxu1 %vm247_vm1, %v248_v9  ;;  %v249_v10 = vmov 0   ;;  %vm194_vm2 = vcmask 123904  }
   0x2   :  { %v230_v3 = vpack.c.bf16 %v23_v1, %v22_v0  ;;  %v25_v4 = vld [vmem:[%s310_s1 + $0x18] sm:$0xff]  ;;  %v20_v5 = vld [vmem:[%s311_s0] sm:$0xff]  ;;  %v21_v7 = vld [vmem:[%s311_s0 + $0x8] sm:$0xff]  ;;  %245 = vset.pattern.permute.xlu0 %v249_v10 }
   0x3   :  { %v234_v6 = vpack.c.bf16 %v25_v4, %v24_v2  ;;  %220 = vmatprep.mubr.msk.f32.mxu0 %vm33_vm0, %v20_v5  ;;  %v118_v11 = vld [vmem:[%s312_s4] sm:$0x3] }
   0x4   :  { %231 = vmatprep.subr.bf16.mxu0 %v230_v3  ;;  %121 = vperm.xlu0 %245, %v118_v11   ;;  %v200_v12 = vld [vmem:[%s313_s2] ss:$0 sm:$0xff] }
   0x5   :  { %233 = vmatpush3.bf16.msra.mxu0 %v230_v3  ;;  %v117_v20 = vld [vmem:[%s314_s3] sm:$0x3] }
   0x6   :  { %235 = vmatprep.subr.bf16.mxu0 %v234_v6 }
   0x9   :  { %237 = vmatpush3.bf16.msra.mxu0 %v234_v6 }
   0xc   :  { %221 = vmatmul.mubr.msk.f32.vlgmr.msra.gmra.mrb[0].mxu0 %vm33_vm0, %v21_v7 }
  0x83   :  { %v122_v21 = vpop.permute.xlu0 %121 }
  0xdf   :  { %v222_v13 = vpop.f32.mrb[0].mxu0 }
  0xe0   :  { %v112_v14 = vadd.f32 %v222_v13, %v200_v12  ;;  %v106_v15 = vpop.f32.mrb[1].mxu0 }
  0xe1   :  { %v107_v16 = vadd.f32 %v200_v12, %v106_v15 }
  0xe2   :  { %v116_v17 = vmax.f32 %v112_v14, 0.0 }
  0xe3   :  { %v115_v18 = vmax.f32 %v107_v16, 0.0 }
  0xe5   :  { %v239_v19 = vpack.c.bf16 %v116_v17, %v115_v18 }
  0xe7   :  { %240 = vmatpush3.bf16.xpose.msra.mxu1 %v239_v19 }
  0xee   :  { %228 = vmatmul.mubr.f32.vlgmr.msra.gmra.mrb[0].mxu1 %v117_v20 }
 0x1c1   :  { %v190_v22 = vpop.f32.mrb[0].mxu1 }
 0x1c2   :  { %v191_v23 = vadd.f32 %v190_v22, %v122_v21  ;;  %v229_v24 = vpop.f32.mrb[1].mxu1 }
 0x1c4   :  { %195 = vst.msk [vmem:[%s315_s5] sm:$0x3] %vm194_vm2, %v191_v23 }

</bundles_post_ra>
